<compile_context>
chip_gen: v7x
topology: tpu7x:2x2x1
jax: 0.10.0
libtpu: 0.0.40
codegen_flags: <defaults>
</compile_context>

<pallas_src>
import jax
import jax.numpy as jnp
from jax.experimental import pallas as pl
from jax.experimental.pallas import tpu as pltpu

_CAT_REPEATS = 3
_NUM_ITERS = 3
_REPS = _CAT_REPEATS ** _NUM_ITERS  # 27 copies along the channel dim


def _model_kernel(x_ref, o_ref):
    # x_ref: (tb, td) lane-dense tile in VMEM
    # o_ref: (tb, 27, td) tile in VMEM (row-major identical to (tb, 27*C, L) slab)
    y = x_ref[...].astype(jnp.float32)   # explicit f32 compute (v5e safety)
    for _ in range(_NUM_ITERS):          # three tanh's (cat commuted out)
        y = jnp.tanh(y)
    y = jnp.maximum(y, 0.0).astype(o_ref.dtype)  # relu, scalar form

    tb, td = y.shape
    # Single full-block store: sublane-axis broadcast of the unique result.
    o_ref[...] = jnp.broadcast_to(y[:, None, :], (tb, _REPS, td))


def _pick_lane_tile(d):
    """Largest 128-multiple tile that evenly divides d (capped at 2048)."""
    for cand in (2048, 1024, 512, 256, 128):
        if d % cand == 0:
            return cand
    # Fall back to full extent (block == array dim satisfies the (8,128) rule;
    # stores are masked but correct).
    return d


def _pick_batch_tile(b):
    for cand in (8,):
        if b % cand == 0:
            return cand
    return b  # full extent


def model_forward(x):
    b, c, l = x.shape
    d = c * l
    x2d = x.reshape(b, d)  # lane-dense input view (free row-major reshape)

    tb = _pick_batch_tile(b)
    td = _pick_lane_tile(d)
    grid = (b // tb, d // td)

    out3d = pl.pallas_call(
        _model_kernel,
        out_shape=jax.ShapeDtypeStruct((b, _REPS, d), x.dtype),
        grid=grid,
        in_specs=[pl.BlockSpec((tb, td), lambda i, j: (i, j))],
        out_specs=pl.BlockSpec((tb, _REPS, td), lambda i, j: (i, 0, j)),
        compiler_params=pltpu.CompilerParams(
            dimension_semantics=("parallel", "parallel"),
        ),
        cost_estimate=pl.CostEstimate(
            flops=b * d,                          # the relu max
            transcendentals=_NUM_ITERS * b * d,   # 3 tanh's on the unique data
            bytes_accessed=(b * d + b * _REPS * d) * x.dtype.itemsize,
        ),
    )(x2d)

    # (B, 27, C*L) and (B, 27*C, L) share the same row-major layout:
    # out[b, k*C + c, l] = relu(tanh^3(x[b, c, l]))  ->  free metadata reshape.
    return out3d.reshape(b, _REPS * c, l)


def _reference(x):
    y = x
    for _ in range(_NUM_ITERS):
        z = jnp.concatenate([y] * _CAT_REPEATS, axis=1)
        y = jnp.tanh(z)
    return jnp.maximum(y, 0.0)


if __name__ == "__main__":
    key = jax.random.PRNGKey(0)
    x = jax.random.normal(key, (2, 3, 4), dtype=jnp.float32)

    out = model_forward(x)
    out = jax.block_until_ready(out)

    ref = _reference(x)
    assert out.shape == (2, 81, 4), out.shape
    assert jnp.allclose(out, ref, atol=1e-5, rtol=1e-5)

    print("KERNEL_OK")
</pallas_src>

<mosaic_0001>
module attributes {stable_mosaic.version = 11 : i64} {
  func.func @_model_kernel(%arg0: i32, %arg1: i32, %arg2: memref<2x12xf32, #tpu.memory_space<vmem>>, %arg3: memref<2x27x12xf32, #tpu.memory_space<vmem>>) attributes {dimension_semantics = [#tpu.dimension_semantics<parallel>, #tpu.dimension_semantics<parallel>], iteration_bounds = array<i64: 1, 1>, scalar_prefetch = 0 : i64, scratch_operands = 0 : i64, tpu.core_type = #tpu.core_type<tc>, window_params = [{transform_indices = @transform_0, window_bounds = array<i64: 2, 12>}, {transform_indices = @transform_1, window_bounds = array<i64: 2, 27, 12>}]} {
    %c0 = arith.constant 0 : index
    %c0_0 = arith.constant 0 : index
    %0 = vector.load %arg2[%c0, %c0_0] : memref<2x12xf32, #tpu.memory_space<vmem>>, vector<2x12xf32>
    %1 = math.tanh %0 : vector<2x12xf32>
    %2 = math.tanh %1 : vector<2x12xf32>
    %3 = math.tanh %2 : vector<2x12xf32>
    %cst = arith.constant 0.000000e+00 : f32
    %4 = vector.broadcast %cst : f32 to vector<2x12xf32>
    %5 = arith.maximumf %3, %4 : vector<2x12xf32>
    %6 = vector.shape_cast %5 : vector<2x12xf32> to vector<2x1x12xf32>
    %7 = vector.shape_cast %6 : vector<2x1x12xf32> to vector<2x1x12xf32>
    %8 = vector.broadcast %7 : vector<2x1x12xf32> to vector<2x27x12xf32>
    %c0_1 = arith.constant 0 : index
    %c0_2 = arith.constant 0 : index
    %c0_3 = arith.constant 0 : index
    %9 = vector.load %arg3[%c0_1, %c0_2, %c0_3] : memref<2x27x12xf32, #tpu.memory_space<vmem>>, vector<2x27x12xf32>
    tpu.vector_store %arg3[%c0_1, %c0_2, %c0_3], %8 {strides = array<i32>} : memref<2x27x12xf32, #tpu.memory_space<vmem>>, vector<2x27x12xf32>,
    return
  }
  func.func @transform_0(%arg0: i32, %arg1: i32) -> (i32, i32) {
    %c0_i32 = arith.constant 0 : i32
    return %arg0, %arg1 : i32, i32
  }
  func.func @transform_1(%arg0: i32, %arg1: i32) -> (i32, i32, i32) {
    %c0_i32 = arith.constant 0 : i32
    %c0_i32_0 = arith.constant 0 : i32
    return %arg0, %c0_i32, %arg1 : i32, i32, i32
  }
}

</mosaic_0001>

<bundles_post_ra>
// kernel: tpu_custom_call.1
= control target key start
LH: loop header
LB: loop body
LE: loop exit
PB: predicated region body
PF: predicated region fallthrough
CT: control target
= control target key end

     0   :  { %6 = vsyncpa [#allocation3], 0  ;;  %s105_s6 = smov [#allocation2]   ;;  %s153_s0 = inlined_call_operand.hbm [shape: f32[2,12], index: 0, kind: input, shape index: {}]   ;;  %s154_s1 = inlined_call_operand.vmem [shape: f32[2,27,12], index: 1, kind: output, shape index: {}]  }
   0x1   :  { %s13_s7 = sshll.u32 %s105_s6, 4  ;;  %s81_s10 = scalar_lea.hbm %s153_s0, 32  ;;  %s14_s7 = int_to_ptr.vmem [resolvable:$true] %s13_s7 }
   0x2   :  { %p82_p0 = scmp.ne.s32.totalorder %s153_s0, %s81_s10  ;;  %p85_p1 = scmp.lt.u32.totalorder %s81_s10, %s153_s0 }
   0x4   :  { %p87_p2 = pnand %p85_p1, %p82_p0 }
   0x6   :  { %90 = shalt.err (!%p87_p2)
}
   0x7   :  { %s91_s15 = scalar_lea.vmem %s14_s7, 32  ;;  %p96_p4 = scmp.lt.s32.totalorder %s14_s7, %s14_s7 }
   0x8   :  { %p92_p3 = scmp.ne.s32.totalorder %s14_s7, %s91_s15  ;;  %p97_p5 = scmp.lt.s32.totalorder %s91_s15, %s91_s15 }
   0xa   :  { %p98_p6 = por %p97_p5, %p96_p4 }
   0xc   :  { %p99_p7 = pnand %p98_p6, %p92_p3 }
   0xe   :  { %102 = shalt.err (!%p99_p7)
}
   0xf   :  { %16 = dma.hbm_to_vmem [thread:$0]  %s153_s0, 32, %s14_s7, [#allocation3]  }
  0x10   :  { %103 = dma.done.wait [#allocation3], 32  }
  0x11   :  { %104 = vsyncadd [#allocation3], 4294967264  ;;  %v20_v0 = vld [vmem:[#allocation2] sm:$0x3]  ;;  %v106_v3 = vmov 1966171168   ;;  %v29_v5 = vlaneseq }
  0x12   :  { %75 = vtanh.f32 %v20_v0  ;;  %v27_v4 = vunpack.c.l.s4 %v106_v3  ;;  %vm58_vm0 = vcmask 97280   ;;  %vm62_vm1 = vcmask 92160  }
  0x13   :  { %v30_v7 = vshrl.u32 %v29_v5, 7 }
  0x14   :  { %v28_v6 = vunpack.c.0.s8 %v27_v4 }
  0x15   :  { %v50_v12 = vsub.s32 0, %v30_v7 }
  0x16   :  { %v31_v8 = vsub.s32 %v28_v6, %v30_v7 }
  0x1c   :  { %v76_v1 = vpop.eup %75 }
  0x1d   :  { %77 = vtanh.f32 %v76_v1 }
  0x27   :  { %v78_v2 = vpop.eup %77 }
  0x28   :  { %79 = vtanh.f32 %v78_v2 }
  0x32   :  { %v80_v9 = vpop.eup %79 }
  0x33   :  { %v24_v10 = vmax.f32 %v80_v9, 0.0 }
  0x35   :  { %v32_v11 = vrot.slane %v24_v10, %v31_v8 }
  0x37   :  { %v40_v13 = vrot.slane %v32_v11, %v31_v8  ;;  %v33_v14 = vcombine.high %v32_v11, %v32_v11 }
  0x39   :  { %v51_v15 = vrot.slane %v40_v13, %v50_v12  ;;  %v47_v16 = vrot.slane %v33_v14, %v31_v8 }
  0x3b   :  { %59 = vst.msk [vmem:[%s154_s1] sm:$0xff] %vm58_vm0, %v51_v15  ;;  %60 = vst.msk [vmem:[%s154_s1 + $0x8] sm:$0xff] %vm58_vm0, %v51_v15  ;;  %v55_v17 = vrot.slane %v47_v16, %v50_v12 }
  0x3c   :  { %61 = vst.msk [vmem:[%s154_s1 + $0x10] sm:$0xff] %vm58_vm0, %v51_v15 }
  0x3d   :  { %63 = vst.msk [vmem:[%s154_s1 + $0x18] sm:$0x7] %vm62_vm1, %v51_v15  ;;  %67 = vst.msk [vmem:[%s154_s1 + $0x38] sm:$0x7] %vm62_vm1, %v55_v17 }
  0x3e   :  { %64 = vst.msk [vmem:[%s154_s1 + $0x20] sm:$0xff] %vm58_vm0, %v55_v17  ;;  %65 = vst.msk [vmem:[%s154_s1 + $0x28] sm:$0xff] %vm58_vm0, %v55_v17 }
  0x3f   :  { %66 = vst.msk [vmem:[%s154_s1 + $0x30] sm:$0xff] %vm58_vm0, %v55_v17 }
  0x40   :  { %72 = vsyncpa [#allocation3], 1 }

</bundles_post_ra>
